<compile_context>
chip_gen: v7x
topology: tpu7x:2x2x1
jax: 0.10.0
libtpu: 0.0.40
codegen_flags: <defaults>
</compile_context>

<pallas_src>
import functools
import math

import jax
import jax.numpy as jnp
from jax import lax
from jax.experimental import pallas as pl
from jax.experimental.pallas import tpu as pltpu

_INV_SQRT2 = 1.0 / math.sqrt(2.0)


def _mlp_channel_kernel(x_ref, w1t_ref, w2t_ref, o_ref, *, approximate_gelu, gelu_dtype):
    # x_ref: (1, Cin, TS)  w1t_ref: (Hid, Cin)  w2t_ref: (Cout, Hid)  o_ref: (1, Cout, TS)
    x = x_ref[0]                                                        # (Cin, TS)
    h = jnp.dot(w1t_ref[...], x, preferred_element_type=jnp.float32)   # (Hid, TS), f32 acc
    h = h.astype(gelu_dtype)
    if approximate_gelu:
        # tanh-form GELU -> transcendental goes to the EUP slot, few VALU ops remain.
        # Opt-in: deviates ~1e-3 from PyTorch's exact erf GELU.
        h = jax.nn.gelu(h, approximate=True)
    else:
        # exact (erf-based) GELU, matching PyTorch's default nn.GELU()
        h = (0.5 * h) * (1.0 + lax.erf(h * _INV_SQRT2))
    h = h.astype(w2t_ref.dtype)
    y = jnp.dot(w2t_ref[...], h, preferred_element_type=jnp.float32)   # (Cout, TS)
    o_ref[0] = y.astype(o_ref.dtype)


def _round_up(n, m):
    return ((n + m - 1) // m) * m


def _pick_spatial_tile(S, N, max_tile):
    """Pick a lane-dense spatial tile; prefer no padding, but never shrink below 1024
    lanes just to match an awkward factorization of S."""
    max_tile = max(128, (max_tile // 128) * 128)
    S128 = _round_up(S, 128)
    if S128 <= max_tile:
        tile = S128
    else:
        # Prefer a large divisor of S128 (no padding beyond the 128 lane round-up) ...
        tile = 0
        t = max_tile
        while t >= 1024:
            if S128 % t == 0:
                tile = t
                break
            t -= 128
        # ... otherwise take the full max_tile and pad S up to a multiple of it.
        if tile == 0:
            tile = max_tile
    # v7x has 2 TensorCores: make sure there are at least 2 parallel grid steps.
    while N * pl.cdiv(S, tile) < 2 and tile >= 256:
        tile = max(128, ((tile // 2) // 128) * 128)
    S_pad = pl.cdiv(S, tile) * tile
    return tile, S_pad


def mlp_channel_pallas(x_ncdhw, w1, w2, *, max_tile=8192,
                       approximate_gelu=False, gelu_dtype=jnp.float32):
    """x_ncdhw: (N, Cin, D, H, W);  w1: (Cin, Hid);  w2: (Hid, Cout).

    w1 / w2 correspond to fc1.weight[:, :, 0, 0, 0].T and fc2.weight[:, :, 0, 0, 0].T of
    the PyTorch module (1x1x1 convs, bias=False).  Compute/output dtype follows x's
    dtype (pass bf16 x for the bandwidth win on v6e/v7x; no wrapper-side convert).
    """
    N, Cin, D, H, W = x_ncdhw.shape
    Hid = w1.shape[1]
    Cout = w2.shape[1]
    S = D * H * W
    in_dtype = x_ncdhw.dtype
    itemsize = jnp.dtype(in_dtype).itemsize

    # Channels-first; flatten spatial dims onto the lane axis (free reshape, no transpose).
    x = x_ncdhw.reshape(N, Cin, S)

    # Pre-transpose the (tiny) weights once; cast them to the input dtype.
    w1t = jnp.transpose(w1).astype(in_dtype)   # (Hid, Cin)
    w2t = jnp.transpose(w2).astype(in_dtype)   # (Cout, Hid)

    tile_s, S_pad = _pick_spatial_tile(S, N, max_tile)
    if S_pad != S:
        # gelu(0) = 0 and the padded lanes are sliced off below, so zero-padding is safe.
        x = jnp.pad(x, ((0, 0), (0, 0), (0, S_pad - S)))

    num_tiles = S_pad // tile_s
    grid = (num_tiles, N)   # spatial axis leading; both axes "parallel" for megacore/v7x

    # Explicit scoped-VMEM sizing (v5e default limit is 16 MiB): double-buffered I/O
    # blocks + f32 intermediate + GELU temporaries + weights, with 2x headroom.
    vmem_est = (
        tile_s * itemsize * 2 * (_round_up(Cin, 8) + _round_up(Cout, 8))
        + tile_s * 4 * _round_up(Hid, 8) * 3
        + (Hid * Cin + Cout * Hid) * itemsize * 4
    )
    vmem_limit = int(min(64 << 20, max(2 * vmem_est, 8 << 20)))

    cost = pl.CostEstimate(
        flops=2 * N * S * (Cin * Hid + Hid * Cout),
        transcendentals=N * S * Hid,
        bytes_accessed=N * S * (Cin + Cout) * itemsize
        + (Cin * Hid + Hid * Cout) * itemsize,
    )

    kernel = functools.partial(
        _mlp_channel_kernel,
        approximate_gelu=approximate_gelu,
        gelu_dtype=gelu_dtype,
    )

    out = pl.pallas_call(
        kernel,
        out_shape=jax.ShapeDtypeStruct((N, Cout, S_pad), in_dtype),
        grid_spec=pltpu.PrefetchScalarGridSpec(
            num_scalar_prefetch=0,
            grid=grid,
            in_specs=[
                pl.BlockSpec((1, Cin, tile_s), lambda s, n: (n, 0, s)),
                pl.BlockSpec((Hid, Cin), lambda s, n: (0, 0)),
                pl.BlockSpec((Cout, Hid), lambda s, n: (0, 0)),
            ],
            out_specs=pl.BlockSpec((1, Cout, tile_s), lambda s, n: (n, 0, s)),
        ),
        compiler_params=pltpu.CompilerParams(
            dimension_semantics=("parallel", "parallel"),
            vmem_limit_bytes=vmem_limit,
        ),
        cost_estimate=cost,
    )(x, w1t, w2t)

    if S_pad != S:
        # Only happens when S has an awkward factorization; costs one extra output pass.
        out = out[..., :S]
    return out.reshape(N, Cout, D, H, W)


def reference_mlp_channel(x_ncdhw, w1, w2):
    h = jnp.einsum("ncdhw,ce->nedhw", x_ncdhw, w1)
    h = 0.5 * h * (1.0 + lax.erf(h * _INV_SQRT2))
    return jnp.einsum("nedhw,eo->nodhw", h, w2)


if __name__ == "__main__":
    # small shapes consistent with the module: N=2, Cin=4, hidden=32, Cout=4, D=H=W=8
    N, Cin, Hid, Cout = 2, 4, 32, 4
    D = H = W = 8

    key = jax.random.PRNGKey(0)
    kx, k1, k2 = jax.random.split(key, 3)

    x = jax.random.normal(kx, (N, Cin, D, H, W), dtype=jnp.float32)
    # fc1: Conv3d(Cin, Hid, 1, bias=False) weight (Hid, Cin, 1, 1, 1) -> (Cin, Hid)
    w1 = jax.random.normal(k1, (Cin, Hid), dtype=jnp.float32) / math.sqrt(Cin)
    # fc2: Conv3d(Hid, Cout, 1, bias=False) weight (Cout, Hid, 1, 1, 1) -> (Hid, Cout)
    w2 = jax.random.normal(k2, (Hid, Cout), dtype=jnp.float32) / math.sqrt(Hid)

    ref = reference_mlp_channel(x, w1, w2)

    # Exact (erf) GELU path: matches PyTorch's default nn.GELU.
    out = jax.block_until_ready(mlp_channel_pallas(x, w1, w2))
    assert out.shape == (N, Cout, D, H, W)
    assert jnp.allclose(out, ref, atol=1e-5, rtol=1e-5)

    # Opt-in tanh-approximate GELU path (EUP-friendly); numerics deviate ~1e-3.
    out_fast = jax.block_until_ready(
        mlp_channel_pallas(x, w1, w2, approximate_gelu=True)
    )
    assert jnp.allclose(out_fast, ref, atol=3e-2, rtol=3e-2)

    print("KERNEL_OK")
</pallas_src>

<mosaic_0001>
module attributes {stable_mosaic.version = 11 : i64} {
  func.func @_mlp_channel_kernel(%arg0: i32, %arg1: i32, %arg2: memref<1x4x512xf32, #tpu.memory_space<vmem>>, %arg3: memref<32x4xf32, #tpu.memory_space<vmem>>, %arg4: memref<4x32xf32, #tpu.memory_space<vmem>>, %arg5: memref<1x4x512xf32, #tpu.memory_space<vmem>>) attributes {dimension_semantics = [#tpu.dimension_semantics<parallel>, #tpu.dimension_semantics<parallel>], iteration_bounds = array<i64: 1, 2>, scalar_prefetch = 0 : i64, scratch_operands = 0 : i64, tpu.core_type = #tpu.core_type<tc>, window_params = [{transform_indices = @transform_0, window_bounds = array<i64: 1, 4, 512>}, {pipeline_mode = #tpu.pipeline_mode<synchronous>, transform_indices = @transform_1, window_bounds = array<i64: 32, 4>}, {pipeline_mode = #tpu.pipeline_mode<synchronous>, transform_indices = @transform_2, window_bounds = array<i64: 4, 32>}, {transform_indices = @transform_3, window_bounds = array<i64: 1, 4, 512>}]} {
    %c0 = arith.constant 0 : index
    %c0_0 = arith.constant 0 : index
    %c0_1 = arith.constant 0 : index
    %0 = vector.load %arg2[%c0, %c0_0, %c0_1] : memref<1x4x512xf32, #tpu.memory_space<vmem>>, vector<1x4x512xf32>
    %1 = vector.shape_cast %0 : vector<1x4x512xf32> to vector<4x512xf32>
    %c0_2 = arith.constant 0 : index
    %c0_3 = arith.constant 0 : index
    %2 = vector.load %arg3[%c0_2, %c0_3] : memref<32x4xf32, #tpu.memory_space<vmem>>, vector<32x4xf32>
    %cst = arith.constant dense<0.000000e+00> : vector<32x512xf32>
    %3 = tpu.matmul %2, %1, %cst {dimension_numbers = #tpu.dot_dimension_numbers<[1], [0], [0], [1], [0, 0, 1, 1], [], []>} : vector<32x4xf32>, vector<4x512xf32>, vector<32x512xf32> -> vector<32x512xf32>
    %cst_4 = arith.constant 5.000000e-01 : f32
    %4 = vector.broadcast %cst_4 : f32 to vector<32x512xf32>
    %5 = arith.mulf %4, %3 : vector<32x512xf32>
    %cst_5 = arith.constant 0.707106769 : f32
    %6 = vector.broadcast %cst_5 : f32 to vector<32x512xf32>
    %7 = arith.mulf %3, %6 : vector<32x512xf32>
    %8 = math.erf %7 : vector<32x512xf32>
    %cst_6 = arith.constant 1.000000e+00 : f32
    %9 = vector.broadcast %cst_6 : f32 to vector<32x512xf32>
    %10 = arith.addf %9, %8 : vector<32x512xf32>
    %11 = arith.mulf %5, %10 : vector<32x512xf32>
    %c0_7 = arith.constant 0 : index
    %c0_8 = arith.constant 0 : index
    %12 = vector.load %arg4[%c0_7, %c0_8] : memref<4x32xf32, #tpu.memory_space<vmem>>, vector<4x32xf32>
    %cst_9 = arith.constant dense<0.000000e+00> : vector<4x512xf32>
    %13 = tpu.matmul %12, %11, %cst_9 {dimension_numbers = #tpu.dot_dimension_numbers<[1], [0], [0], [1], [0, 0, 1, 1], [], []>} : vector<4x32xf32>, vector<32x512xf32>, vector<4x512xf32> -> vector<4x512xf32>
    %c0_10 = arith.constant 0 : index
    %c0_11 = arith.constant 0 : index
    %c0_12 = arith.constant 0 : index
    %14 = vector.load %arg5[%c0_10, %c0_11, %c0_12] : memref<1x4x512xf32, #tpu.memory_space<vmem>>, vector<1x4x512xf32>
    %15 = vector.shape_cast %14 : vector<1x4x512xf32> to vector<4x512xf32>
    %16 = vector.shape_cast %13 : vector<4x512xf32> to vector<1x4x512xf32>
    tpu.vector_store %arg5[%c0_10, %c0_11, %c0_12], %16 {strides = array<i32>} : memref<1x4x512xf32, #tpu.memory_space<vmem>>, vector<1x4x512xf32>,
    return
  }
  func.func @transform_0(%arg0: i32, %arg1: i32) -> (i32, i32, i32) {
    %c0_i32 = arith.constant 0 : i32
    %c0_i32_0 = arith.constant 0 : i32
    return %arg1, %c0_i32, %arg0 : i32, i32, i32
  }
  func.func @transform_1(%arg0: i32, %arg1: i32) -> (i32, i32) {
    %c0_i32 = arith.constant 0 : i32
    %c0_i32_0 = arith.constant 0 : i32
    %c0_i32_1 = arith.constant 0 : i32
    return %c0_i32, %c0_i32_0 : i32, i32
  }
  func.func @transform_2(%arg0: i32, %arg1: i32) -> (i32, i32) {
    %c0_i32 = arith.constant 0 : i32
    %c0_i32_0 = arith.constant 0 : i32
    %c0_i32_1 = arith.constant 0 : i32
    return %c0_i32, %c0_i32_0 : i32, i32
  }
  func.func @transform_3(%arg0: i32, %arg1: i32) -> (i32, i32, i32) {
    %c0_i32 = arith.constant 0 : i32
    %c0_i32_0 = arith.constant 0 : i32
    return %arg1, %c0_i32, %arg0 : i32, i32, i32
  }
}

</mosaic_0001>

<bundles_post_ra>
// kernel: tpu_custom_call.1
= control target key start
LH: loop header
LB: loop body
LE: loop exit
PB: predicated region body
PF: predicated region fallthrough
CT: control target
= control target key end

     0   :  { %8 = vsyncpa [#allocation3], 0  ;;  %s1140_s0 = inlined_call_operand.vmem [shape: f32[2,4,512], index: 0, kind: input, shape index: {}]   ;;  %s1141_s1 = inlined_call_operand.vmem [shape: f32[32,4], index: 1, kind: input, shape index: {}]   ;;  %s1142_s2 = inlined_call_operand.vmem [shape: f32[4,32], index: 2, kind: input, shape index: {}]   ;;  %s1143_s3 = inlined_call_operand.hbm [shape: f32[2,4,512], index: 3, kind: output, shape index: {}]  }
   0x1   :  { %10 = vsyncpa [#allocation3 + $0x1], 0  ;;  %s977_s12 = smov 0   ;;  %s979_s13 = smov 0  }
   0x2   :  { %s981_s14 = smov 0   ;;  %s983_s15 = smov 0  }
   0x3   :  { %s985_s16 = smov 0   ;;  %s987_s17 = smov 0  }
   0x4 LB: > { %s740_s18 = sadd.s32 4294967295, %s953_s17   ;;  %s741_s19 = sadd.s32 4294967294, %s953_s17   ;;  %s953_s17 = sphi %s987_s17, %s16_s17   ;;  %s949_s16 = sphi %s985_s16, %s1150_s16   ;;  %s945_s15 = sphi %s983_s15, %s1149_s15   ;;  %s941_s14 = sphi %s981_s14, %s1148_s14   ;;  %s937_s13 = sphi %s979_s13, %s1147_s13   ;;  %s933_s12 = sphi %s977_s12, %s1146_s12  }
   0x5   : > { %s25_s20 = sadd.s32 1, %s949_s16  ;;  %s107_s21 = sadd.s32 1, %s941_s14 }
   0x6   : > { %p26_p0 = scmp.ge.s32.totalorder %s25_s20, 2  ;;  %p117_p1 = scmp.ne.s32.totalorder %s941_s14, %s937_s13 }
   0x7   : > { %p118_p2 = scmp.eq.s32.totalorder %s740_s18, 1  ;;  %p123_p3 = scmp.ne.s32.totalorder %s937_s13, %s933_s12 }
   0x8   : > { %s1152_s20 = smov (%p26_p0, %s25_s20), 0  ;;  %p124_p5 = scmp.eq.s32.totalorder %s741_s19, 1 }
   0x9   : > { %p1017_p4 = por %p118_p2, %p117_p1  ;;  %s102_s23 = ssub.s32 %s949_s16, %s1152_s20 }
   0xa   : > { %p744_p6 = scmp.ge.s32.totalorder %s953_s17, 1  ;;  %p105_p7 = scmp.eq.s32.totalorder %s102_s23, 0 }
   0xb   : > { %p1024_p8 = por %p124_p5, %p123_p3  ;;  %p161_p9 = scmp.lt.s32.totalorder %s953_s17, 3 }
   0xc   : > { %s1030_s25 = scalar_select %p105_p7, %s941_s14, %s107_s21  }
   0xd   : > { %p162_p10 = pnand %p744_p6, %p161_p9 }
   0xe   : > { %p190_p11 = scmp.lt.s32.totalorder (!%p162_p10), %s945_s15, 1  ;;  %v955_v0 = vmov (!%p162_p10), 0.0   ;;  %vm223_vm0 = vcmask (!%p162_p10), 1043456   ;;  %v202_v5 = vld [vmem:[%s1141_s1] sm:$0xff] (!%p162_p10)  ;;  %vm210_vm1 = vcmask (!%p162_p10), 31744   ;;  %v203_v6 = vld [vmem:[%s1141_s1 + $0x8] sm:$0xff] (!%p162_p10) }
   0xf   : > { %165 = sbr.rel (%p162_p10) target bundleno = 510 (0x1fe), region = 32  ;;  %296 = vmatprep.mubr.f32.mxu0 (!%p162_p10), %v955_v0  ;;  %385 = vmatprep.mubr.f32.mxu1 (!%p162_p10), %v955_v0  ;;  %v204_v7 = vld [vmem:[%s1141_s1 + $0x10] sm:$0xff] (!%p162_p10)  ;;  %v205_v8 = vld [vmem:[%s1141_s1 + $0x18] sm:$0xff] (!%p162_p10)  ;;  %vm491_vm2 = vcmask (!%p162_p10), 261120   ;;  %s186_s21 = sand.u32 (!%p162_p10), 1, %s937_s13  }
  0x10   : > { %s745_s23 = sshll.u32 (!%p162_p10), %s186_s21, 4  ;;  %s956_s6 = smov (!%p162_p10), [#allocation2]  }
  0x11   : > { %s879_s7 = sshll.u32 (!%p162_p10), %s956_s6, 4  ;;  %s880_s7 = int_to_ptr.vmem [resolvable:$false] %s879_s7 }
  0x12   : > { %s881_s8 = scalar_lea.vmem (!%p162_p10), %s880_s7, 512 }
  0x16   : > { %s191_s26 = scalar_select %p190_p11, %s945_s15, 1 }
  0x18   : > { %s767_s27 = sshll.u32 %s191_s26, 4  ;;  %s768_s26 = sshll.u32 %s945_s15, 8 }
  0x19   : > { %s197_s30 = scalar_lea.vmem %s1140_s0, %s767_s27  ;;  %s188_s27 = scalar_lea.vmem [#allocation2], %s745_s23 }
  0x1a   : > { %v200_v1 = vld [vmem:[%s197_s30] sm:$0xff]  ;;  %v201_v2 = vld [vmem:[%s197_s30 + $0x8] sm:$0xff]  ;;  %s664_s28 = sshll.u32 %s188_s27, 4  ;;  %s1093_s4 = scalar_lea.hbm %s1143_s3, %s768_s26  ;;  %s1095_s28 = int_to_ptr.vmem [resolvable:$true] %s664_s28 }
  0x1b   : > { %v208_v3 = vcombine.high %v200_v1, %v200_v1  ;;  %v209_v4 = vcombine.high %v201_v2, %v201_v2  ;;  %s648_s15 = scalar_lea.sflag [#allocation3], %s186_s21  ;;  %s875_s5 = scalar_lea.vmem %s1095_s28, 256 }
  0x1c   : > { %p876_p12 = scmp.ne.s32.totalorder %s1095_s28, %s875_s5  ;;  %p882_p1 = scmp.lt.s32.totalorder %s1095_s28, %s880_s7 }
  0x1d   : > { %748 = vmatprep.subr.msk.mxu0 %vm223_vm0, %v208_v3  ;;  %754 = vmatprep.subr.msk.mxu1 %vm223_vm0, %v209_v4  ;;  %p883_p2 = scmp.lt.s32.totalorder %s881_s8, %s875_s5 }
  0x1e   : > { %749 = vmatpush1.msk.msra.mxu0 %vm223_vm0, %v200_v1  ;;  %755 = vmatpush1.msk.msra.mxu1 %vm223_vm0, %v201_v2  ;;  %p877_p13 = pnand %p876_p12, %p1017_p4 }
  0x1f   : > { %750 = vmatmul.mubr.msk.f32.vlgmr.msra.gmra.mrb[0].mxu0 %vm210_vm1, %v202_v5  ;;  %756 = vmatmul.mubr.msk.f32.vlgmr.msra.gmra.mrb[0].mxu1 %vm210_vm1, %v202_v5  ;;  %p884_p3 = por %p883_p2, %p882_p1 }
  0x20   : > { %302 = vmatprep.mubr.f32.mxu0 %v955_v0  ;;  %391 = vmatprep.mubr.f32.mxu1 %v955_v0  ;;  %p878_p0 = pneg %p877_p13 }
  0x22   : > { %p885_p5 = pnand %p884_p3, %p878_p0 }
  0x23   : > { %751 = vmatmul.mubr.msk.f32.gmra.mrb[2].mxu0 %vm210_vm1, %v203_v6  ;;  %757 = vmatmul.mubr.msk.f32.gmra.mrb[2].mxu1 %vm210_vm1, %v203_v6 }
  0x24   : > { %308 = vmatprep.mubr.f32.mxu0 %v955_v0  ;;  %397 = vmatprep.mubr.f32.mxu1 %v955_v0 }
  0x27   : > { %752 = vmatmul.mubr.msk.f32.gmra.mrb[4].mxu0 %vm210_vm1, %v204_v7  ;;  %758 = vmatmul.mubr.msk.f32.gmra.mrb[4].mxu1 %vm210_vm1, %v204_v7 }
  0x28   : > { %314 = vmatprep.mubr.f32.mxu0 %v955_v0  ;;  %403 = vmatprep.mubr.f32.mxu1 %v955_v0 }
  0x2b   : > { %753 = vmatmul.mubr.msk.f32.gmra.mrb[6].mxu0 %vm210_vm1, %v205_v8  ;;  %759 = vmatmul.mubr.msk.f32.gmra.mrb[6].mxu1 %vm210_vm1, %v205_v8 }
  0x2c   : > { %559 = vmatprep.mubr.f32.mxu0 %v955_v0  ;;  %630 = vmatprep.mubr.f32.mxu1 %v955_v0 }
  0xf2   : > { %v298_v9 = vpop.f32.mrb[0].mxu0  ;;  %v387_v10 = vpop.f32.mrb[0].mxu1 }
  0xf3   : > { %v426_v11 = vmul.f32 0.70710677, %v298_v9  ;;  %v428_v12 = vmul.f32 0.70710677, %v387_v10  ;;  %v300_v13 = vpop.f32.mrb[1].mxu0  ;;  %v389_v14 = vpop.f32.mrb[1].mxu1 }
  0xf4   : > { %v427_v15 = vmul.f32 0.70710677, %v300_v13  ;;  %v429_v16 = vmul.f32 0.70710677, %v389_v14  ;;  %v410_v44 = vmul.f32 0.5, %v298_v9  ;;  %v412_v48 = vmul.f32 0.5, %v387_v10 }
  0xf5   : > { %843 = verf.f32 %v426_v11  ;;  %v411_v50 = vmul.f32 0.5, %v300_v13  ;;  %v413_v56 = vmul.f32 0.5, %v389_v14 }
  0xf6   : > { %845 = verf.f32 %v428_v12  ;;  %v304_v17 = vpop.f32.mrb[2].mxu0  ;;  %v393_v18 = vpop.f32.mrb[2].mxu1 }
  0xf7   : > { %847 = verf.f32 %v427_v15  ;;  %v430_v19 = vmul.f32 0.70710677, %v304_v17  ;;  %v306_v20 = vpop.f32.mrb[3].mxu0  ;;  %v395_v21 = vpop.f32.mrb[3].mxu1  ;;  %v432_v22 = vmul.f32 0.70710677, %v393_v18 }
  0xf8   : > { %849 = verf.f32 %v429_v16  ;;  %v431_v23 = vmul.f32 0.70710677, %v306_v20  ;;  %v433_v24 = vmul.f32 0.70710677, %v395_v21  ;;  %v414_v53 = vmul.f32 0.5, %v304_v17 }
  0xf9   : > { %851 = verf.f32 %v430_v19  ;;  %v416_v58 = vmul.f32 0.5, %v393_v18  ;;  %v415_v63 = vmul.f32 0.5, %v306_v20  ;;  %v417_v4 = vmul.f32 0.5, %v395_v21 }
  0xfa   : > { %853 = verf.f32 %v432_v22  ;;  %v1057_v25 = vpop.f32.mrb[4].mxu0  ;;  %v1059_v26 = vpop.f32.mrb[4].mxu1 }
  0xfb   : > { %855 = verf.f32 %v431_v23  ;;  %v434_v27 = vmul.f32 0.70710677, %v1057_v25  ;;  %v1062_v28 = vpop.f32.mrb[5].mxu0  ;;  %v1064_v29 = vpop.f32.mrb[5].mxu1  ;;  %v436_v30 = vmul.f32 0.70710677, %v1059_v26 }
  0xfc   : > { %857 = verf.f32 %v433_v24  ;;  %v435_v31 = vmul.f32 0.70710677, %v1062_v28  ;;  %v437_v32 = vmul.f32 0.70710677, %v1064_v29  ;;  %v418_v18 = vmul.f32 0.5, %v1057_v25 }
  0xfd   : > { %859 = verf.f32 %v434_v27  ;;  %v420_v19 = vmul.f32 0.5, %v1059_v26  ;;  %v419_v23 = vmul.f32 0.5, %v1062_v28 }
  0xfe   : > { %861 = verf.f32 %v436_v30  ;;  %v316_v33 = vpop.f32.mrb[6].mxu0  ;;  %v1069_v34 = vpop.f32.mrb[6].mxu1 }
  0xff   : > { %v844_v35 = vpop.eup %843  ;;  %863 = verf.f32 %v435_v31  ;;  %v438_v36 = vmul.f32 0.70710677, %v316_v33  ;;  %v1071_v37 = vpop.f32.mrb[7].mxu0  ;;  %v440_v40 = vmul.f32 0.70710677, %v1069_v34  ;;  %v422_v27 = vmul.f32 0.5, %v316_v33 }
 0x100   : > { %v1073_v38 = vpop.f32.mrb[7].mxu1  ;;  %v846_v39 = vpop.eup %845  ;;  %865 = verf.f32 %v437_v32  ;;  %v439_v42 = vmul.f32 0.70710677, %v1071_v37  ;;  %v458_v45 = vadd.f32 1.0, %v844_v35  ;;  %v421_v32 = vmul.f32 0.5, %v1064_v29 }
 0x101   : > { %v848_v41 = vpop.eup %847  ;;  %867 = verf.f32 %v438_v36  ;;  %v441_v46 = vmul.f32 0.70710677, %v1073_v38  ;;  %v460_v49 = vadd.f32 1.0, %v846_v39  ;;  %v424_v36 = vmul.f32 0.5, %v1069_v34 }
 0x102   : > { %v850_v43 = vpop.eup %849  ;;  %869 = verf.f32 %v440_v40  ;;  %v459_v52 = vadd.f32 1.0, %v848_v41  ;;  %v474_v61 = vmul.f32 %v458_v45, %v410_v44  ;;  %v423_v41 = vmul.f32 0.5, %v1071_v37  ;;  %v490_v37 = vld [vmem:[%s1142_s2] sm:$0xf] }
 0x103   : > { %v852_v47 = vpop.eup %851  ;;  %871 = verf.f32 %v439_v42  ;;  %v461_v57 = vadd.f32 1.0, %v850_v43  ;;  %v476_v2 = vmul.f32 %v460_v49, %v412_v48  ;;  %v425_v43 = vmul.f32 0.5, %v1073_v38 }
 0x104   : > { %v854_v51 = vpop.eup %853  ;;  %v462_v54 = vadd.f32 1.0, %v852_v47  ;;  %873 = verf.f32 %v441_v46  ;;  %v475_v7 = vmul.f32 %v459_v52, %v411_v50 }
 0x105   : > { %v856_v55 = vpop.eup %855  ;;  %v464_v59 = vadd.f32 1.0, %v854_v51  ;;  %v477_v11 = vmul.f32 %v461_v57, %v413_v56 }
 0x106   : > { %v858_v60 = vpop.eup %857  ;;  %v478_v62 = vmul.f32 %v462_v54, %v414_v53  ;;  %v463_v0 = vadd.f32 1.0, %v856_v55 }
 0x107   : > { %v860_v1 = vpop.eup %859  ;;  %v480_v3 = vmul.f32 %v464_v59, %v416_v58  ;;  %v465_v5 = vadd.f32 1.0, %v858_v60 }
 0x108   : > { %v862_v6 = vpop.eup %861  ;;  %v771_v8 = vpack.c.bf16 %v478_v62, %v474_v61  ;;  %v479_v9 = vmul.f32 %v463_v0, %v415_v63  ;;  %v466_v15 = vadd.f32 1.0, %v860_v1 }
 0x109   : > { %v864_v10 = vpop.eup %863  ;;  %v779_v12 = vpack.c.bf16 %v480_v3, %v476_v2  ;;  %v481_v13 = vmul.f32 %v465_v5, %v417_v4  ;;  %v468_v20 = vadd.f32 1.0, %v862_v6 }
 0x10a   : > { %v866_v14 = vpop.eup %865  ;;  %v769_v16 = vpack.c.bf16 %v479_v9, %v475_v7  ;;  %v467_v24 = vadd.f32 1.0, %v864_v10  ;;  %v482_v26 = vmul.f32 %v466_v15, %v418_v18 }
 0x10b   : > { %v868_v17 = vpop.eup %867  ;;  %v777_v22 = vpack.c.bf16 %v481_v13, %v477_v11  ;;  %v469_v35 = vadd.f32 1.0, %v866_v14  ;;  %v484_v28 = vmul.f32 %v468_v20, %v420_v19 }
 0x10c   : > { %v870_v21 = vpop.eup %869  ;;  %v470_v30 = vadd.f32 1.0, %v868_v17  ;;  %770 = vmatprep.subr.bf16.mxu0 %v769_v16  ;;  %v483_v45 = vmul.f32 %v467_v24, %v419_v23 }
 0x10d   : > { %v872_v31 = vpop.eup %871  ;;  %v472_v39 = vadd.f32 1.0, %v870_v21  ;;  %778 = vmatprep.subr.bf16.mxu1 %v777_v22  ;;  %772 = vmatpush1.bf16.msra.mxu0 %v771_v8  ;;  %v485_v34 = vmul.f32 %v469_v35, %v421_v32 }
 0x10e   : > { %v874_v25 = vpop.eup %873  ;;  %v486_v40 = vmul.f32 %v470_v30, %v422_v27  ;;  %v471_v42 = vadd.f32 1.0, %v872_v31  ;;  %780 = vmatpush1.bf16.msra.mxu1 %v779_v12 }
 0x10f   : > { %v488_v33 = vmul.f32 %v472_v39, %v424_v36  ;;  %v473_v44 = vadd.f32 1.0, %v874_v25 }
 0x110   : > { %v775_v29 = vpack.c.bf16 %v486_v40, %v482_v26  ;;  %v487_v46 = vmul.f32 %v471_v42, %v423_v41 }
 0x111   : > { %v783_v47 = vpack.c.bf16 %v488_v33, %v484_v28  ;;  %v489_v48 = vmul.f32 %v473_v44, %v425_v43 }
 0x112   : > { %v773_v49 = vpack.c.bf16 %v487_v46, %v483_v45 }
 0x113   : > { %v781_v50 = vpack.c.bf16 %v489_v48, %v485_v34 }
 0x114   : > { %774 = vmatprep.subr.bf16.mxu0 %v773_v49 }
 0x115   : > { %782 = vmatprep.subr.bf16.mxu1 %v781_v50  ;;  %776 = vmatpush1.bf16.msra.mxu0 %v775_v29 }
 0x116   : > { %784 = vmatpush1.bf16.msra.mxu1 %v783_v47 }
 0x118   : > { %760 = vmatmul.mubr.msk.f32.vlgmr.msra.gmra.mrb[8].mxu0 %vm491_vm2, %v490_v37 }
 0x119   : > { %761 = vmatmul.mubr.msk.f32.vlgmr.msra.gmra.mrb[8].mxu1 %vm491_vm2, %v490_v37 }
 0x1eb   : > { %v561_v38 = vpop.f32.mrb[8].mxu0 }
 0x1ec   : > { %v632_v51 = vpop.f32.mrb[8].mxu1  ;;  %v563_v52 = vpop.f32.mrb[9].mxu0 }
 0x1ed   : > { %v641_v53 = vcombine.low %v561_v38, %v563_v52  ;;  %v634_v54 = vpop.f32.mrb[9].mxu1 }
 0x1ee   : > { %v642_v55 = vcombine.low %v632_v51, %v634_v54 }
 0x1ef   : > { %645 = vst [vmem:[%s188_s27] sm:$0xff] %v641_v53 }
 0x1f0   : > { %646 = vst [vmem:[%s188_s27 + $0x8] sm:$0xff] %v642_v55 }
 0x1f1   : > { %888 = shalt.err (!%p885_p5)
}
 0x1f2   : > { %s889_s9 = scalar_lea.hbm %s1093_s4, 256  ;;  %s893_s18 = scalar_lea.hbm %s1143_s3, 512 }
 0x1f3   : > { %p890_p6 = scmp.ne.s32.totalorder %s1093_s4, %s889_s9  ;;  %p894_p10 = scmp.lt.u32.totalorder %s1093_s4, %s1143_s3 }
 0x1f4   : > { %p895_p11 = scmp.lt.u32.totalorder %s893_s18, %s889_s9  ;;  %p897_p13 = scmp.lt.u32.totalorder %s889_s9, %s1093_s4 }
 0x1f5   : > { %p891_p7 = pnand %p890_p6, %p1017_p4 }
 0x1f6   : > { %p896_p12 = por %p895_p11, %p894_p10 }
 0x1f7   : > { %p892_p9 = pneg %p891_p7 }
 0x1f8   : > { %p898_p0 = por %p897_p13, %p896_p12 }
 0x1fa   : > { %p899_p1 = pnand %p898_p0, %p892_p9 }
 0x1fc   : > { %902 = shalt.err (!%p899_p1)
}
 0x1fd   : > { %785 = dma.vmem_to_hbm [thread:$0]  (%p1017_p4), %s1095_s28, 256, %s1093_s4, %s648_s15  }
 0x1fe PF: > { %p791_p2 = scmp.ge.s32.totalorder %s953_s17, 2  ;;  %s676_s23 = sand.u32 1, %s933_s12  }
 0x1ff   : > { %s677_s26 = scalar_lea.sflag [#allocation3], %s676_s23 }
 0x200   : > { %p788_p3 = pnand %p791_p2, %p1024_p8 }
 0x202   : > { %928 = dma.done.wait (!%p788_p3), %s677_s26, 256  }
 0x203   : > { %930 = vsyncadd (!%p788_p3), %s677_s26, 4294967040  ;;  %s16_s17 = sadd.s32 1, %s953_s17   ;;  %s1146_s12 = smov %s937_s13 }
 0x204   : > { %p13_p5 = scmp.ge.s32.totalorder %s16_s17, 4   ;;  %s1147_s13 = smov %s941_s14 }
 0x205   : > { %s1148_s14 = smov %s1030_s25  ;;  %s1149_s15 = smov %s949_s16 }
 0x206   : > { %s1150_s16 = smov %s1152_s20  ;;  %15 = sbr.rel (!%p13_p5) target bundleno = 4 (0x4), region = 67 }
 0x20d   :  { %682 = vsyncpa [#allocation3], 1 }
 0x20e   :  { %684 = vsyncpa [#allocation3 + $0x1], 1 }

</bundles_post_ra>
